<compile_context>
chip_gen: v5e
topology: v5e:2x2
jax: 0.10.0
libtpu: 0.0.40
codegen_flags: <defaults>
</compile_context>

<pallas_src>
import functools

import jax
import jax.numpy as jnp
from jax import lax
from jax.experimental import pallas as pl
from jax.experimental.pallas import tpu as pltpu

_MIB = 1024 * 1024


def _div_candidates(dim, candidates):
    """Tile candidates (largest first) that evenly divide `dim`; fallback: full dim."""
    good = [c for c in candidates if c <= dim and dim % c == 0]
    # TODO(synk): replace the full-dim fallback with pl.cdiv grids + masked tails so
    # awkward (non-128-multiple) shapes keep bounded, double-buffered tiles.
    return good if good else [dim]


def _vmem_limit(estimate_bytes):
    # Cap at 48 MiB: leaves headroom on v7x (64 MiB VMEM / TC); v5e/v6e have 128 MiB.
    return int(min(max(estimate_bytes + 8 * _MIB, 32 * _MIB), 48 * _MIB))


# -----------------------------------------------------------------------------
# Kernel 1: tiled dense / linear layer   out = x @ W + b   (bf16 MXU, f32 accum)
# -----------------------------------------------------------------------------
def _linear_kernel(x_ref, w_ref, b_ref, o_ref, acc_ref):
    @pl.when(pl.program_id(2) == 0)
    def _init():
        acc_ref[...] = jnp.zeros(acc_ref.shape, jnp.float32)

    # bf16 operands on the MXU (native dtype on v5e/v6e/v7x), f32 accumulation.
    acc_ref[...] += jnp.dot(
        x_ref[...].astype(jnp.bfloat16),
        w_ref[...].astype(jnp.bfloat16),
        preferred_element_type=jnp.float32)

    @pl.when(pl.program_id(2) == pl.num_programs(2) - 1)
    def _store():
        o_ref[...] = (acc_ref[...] + b_ref[...].astype(jnp.float32)).astype(o_ref.dtype)


def _linear_tiles(M, N, K):
    budget = 36 * _MIB
    tm_c = _div_candidates(M, (512, 256, 128))
    tn_c = _div_candidates(N, (512, 256, 128))
    # TODO(synk): on v6e (128 MiB VMEM) tk up to 2048 and tm/tn up to 1024 reach
    # ~85% of the HBM roofline on these mem-bound projections; kept moderate so a
    # single tiling also fits v5e/v7x budgets.
    tk_c = _div_candidates(K, (1024, 512, 256, 128))

    def est(tm, tn, tk):
        blocks = 2 * (tm * tk * 4 + tk * tn * 2 + tn * 4) + 2 * tm * tn * 4
        return blocks + tm * tn * 4          # + f32 accumulator scratch

    for tm in tm_c:
        for tn in tn_c:
            for tk in tk_c:
                if est(tm, tn, tk) <= budget:
                    return tm, tn, tk, est(tm, tn, tk)
    tm, tn, tk = tm_c[-1], tn_c[-1], tk_c[-1]
    return tm, tn, tk, est(tm, tn, tk)


def linear(x, w, b):
    """x: (M, K) f32, w: (K, N), b: (N,) -> (M, N) in x.dtype."""
    M, K = x.shape
    N = w.shape[1]
    tm, tn, tk, est = _linear_tiles(M, N, K)
    # Weights stored/DMA'd as bf16: halves weight block bytes; MXU takes bf16 anyway.
    w16 = w.astype(jnp.bfloat16)
    grid = (M // tm, N // tn, K // tk)
    return pl.pallas_call(
        _linear_kernel,
        out_shape=jax.ShapeDtypeStruct((M, N), x.dtype),
        grid=grid,
        in_specs=[
            pl.BlockSpec((tm, tk), lambda i, j, k: (i, k)),
            pl.BlockSpec((tk, tn), lambda i, j, k: (k, j)),
            pl.BlockSpec((1, tn), lambda i, j, k: (0, j)),
        ],
        out_specs=pl.BlockSpec((tm, tn), lambda i, j, k: (i, j)),
        scratch_shapes=[pltpu.VMEM((tm, tn), jnp.float32)],
        compiler_params=pltpu.CompilerParams(
            dimension_semantics=("parallel", "parallel", "arbitrary"),
            vmem_limit_bytes=_vmem_limit(est),
        ),
    )(x, w16, b.reshape(1, N))


# -----------------------------------------------------------------------------
# Kernel 2: flash-style multi-head attention over lane-dense [B, L, E] blocks.
# Grid = (batch, q block, kv block); kv is the (innermost) reduction axis.
# -----------------------------------------------------------------------------
def _flash_attention_kernel(q_ref, k_ref, v_ref, o_ref,
                            q_sc, k_sc, v_sc, m_sc, l_sc, acc_sc,
                            *, num_heads, head_dim, scale):
    """Per-head state lives in head-major VMEM scratch:
       q_sc   (H, tq, D)   bf16  q * scale, written once per q block (ki == 0)
       k_sc   (H, tk, D)   bf16  current K block (rewritten every kv step)
       v_sc   (H, tk, D)   bf16  current V block (rewritten every kv step)
       m_sc   (H, tq, 128) f32   running max, lane-replicated (full-width stores)
       l_sc   (H, tq, 128) f32   running sum, lane-replicated (full-width stores)
       acc_sc (H, tq, D)   f32   un-normalized output accumulator
    """
    ki = pl.program_id(2)
    D = head_dim

    @pl.when(ki == 0)
    def _init():
        m_sc[...] = jnp.full(m_sc.shape, -jnp.inf, jnp.float32)
        l_sc[...] = jnp.zeros(l_sc.shape, jnp.float32)
        acc_sc[...] = jnp.zeros(acc_sc.shape, jnp.float32)
        # Hoisted out of the KV loop: the q block is resident across ki (its
        # index_map ignores ki), so scale + per-head slicing happen once per q block.
        for h in range(num_heads):
            q_sc[h] = (q_ref[0, :, h * D:(h + 1) * D] * scale).astype(jnp.bfloat16)

    # One slicing + bf16-cast pass over the current K/V block; the compute loop
    # below only touches lane-aligned slabs via leading-axis indexing.
    for h in range(num_heads):
        k_sc[h] = k_ref[0, :, h * D:(h + 1) * D].astype(jnp.bfloat16)
        v_sc[h] = v_ref[0, :, h * D:(h + 1) * D].astype(jnp.bfloat16)

    def head_step(h, carry):
        # Scores: contract head_dim directly (q @ k^T without materializing k^T).
        # TODO(synk): confirm with pl.lower_as_mlir that no per-step XLU transpose of
        # k is inserted; if it is, write K D-major from the key projection instead.
        s = lax.dot_general(q_sc[h], k_sc[h],
                            dimension_numbers=(((1,), (1,)), ((), ())),
                            preferred_element_type=jnp.float32)       # (tq, tk)
        s_max = jnp.max(s, axis=-1, keepdims=True)                    # (tq, 1)
        m_prev = m_sc[h]                                              # (tq, 128)
        m_new = jnp.maximum(m_prev, s_max)                            # (tq, 128)
        m_col = m_new[:, :1]                                          # (tq, 1)
        alpha = jnp.exp(m_prev[:, :1] - m_col)                        # (tq, 1)
        # TODO(synk): on v6e/v7x this exp is the EUP roofline at small head_dim;
        # bf16 exp would ~double EUP throughput there (not available on v5e).
        p = jnp.exp(s - m_col)                                        # (tq, tk)
        pv = lax.dot_general(p.astype(jnp.bfloat16), v_sc[h],
                             dimension_numbers=(((1,), (0,)), ((), ())),
                             preferred_element_type=jnp.float32)      # (tq, D)
        # Full-width lane-replicated state stores; accumulator slab is lane-aligned.
        m_sc[h] = m_new
        l_sc[h] = alpha * l_sc[h] + jnp.sum(p, axis=-1, keepdims=True)
        acc_sc[h] = alpha * acc_sc[h] + pv
        return carry

    if num_heads <= 4:
        for h in range(num_heads):            # full static unroll for small H
            head_step(h, 0)
    else:
        # Rolled loop bounds per-head vreg live ranges (p / alpha / pv) for larger H.
        lax.fori_loop(0, num_heads, head_step, 0)

    @pl.when(ki == pl.num_programs(2) - 1)
    def _finalize():
        # TODO(synk): assembling one (tq, E) value (lane concat of the per-head slabs)
        # and doing a single unmasked full-width store would further reduce writeback
        # cost; kept per-head stores here (finalize runs once per q block) pending
        # verification that minor-dim concat of D<128 slabs lowers cleanly.
        for h in range(num_heads):
            l_col = l_sc[h][:, :1]                                    # (tq, 1)
            inv = pl.reciprocal(l_col, approx=True)                   # EUP slot
            inv = inv * (2.0 - l_col * inv)        # one Newton step -> ~f32 accuracy
            o_ref[0, :, h * D:(h + 1) * D] = (acc_sc[h] * inv).astype(o_ref.dtype)


def _attention_tiles(Lq, Lk, E, num_heads):
    budget = 36 * _MIB                      # estimate fed into _vmem_limit below

    def est(tq, tk):
        blocks = 2 * (2 * tq * E * 4 + 2 * tk * E * 4)       # dbl-buffered q,o / k,v (f32)
        scratch = ((tq + 2 * tk) * E * 2                     # bf16 head-major q/k/v
                   + tq * E * 4                              # f32 accumulator
                   + 2 * num_heads * tq * 128 * 4)           # lane-replicated m, l
        return blocks + scratch

    tq_c = _div_candidates(Lq, (256, 128))
    tk_c = _div_candidates(Lk, (512, 256, 128))
    for tq in tq_c:
        for tk in tk_c:
            if est(tq, tk) <= budget:
                return tq, tk, est(tq, tk)
    tq, tk = tq_c[-1], tk_c[-1]
    return tq, tk, est(tq, tk)


def flash_mha(q, k, v, num_heads):
    """q: (B, Lq, E), k/v: (B, Lk, E) -> (B, Lq, E); heads handled inside the kernel."""
    B, Lq, E = q.shape
    Lk = k.shape[1]
    assert E % num_heads == 0, "embed_dim must be divisible by num_heads"
    D = E // num_heads
    tq, tk, est = _attention_tiles(Lq, Lk, E, num_heads)
    kernel = functools.partial(_flash_attention_kernel, num_heads=num_heads,
                               head_dim=D, scale=1.0 / (D ** 0.5))
    # TODO(synk): on v7x (2 TensorCores) ensure B * (Lq // tq) >= 2 (shrink tq or add a
    # head grid axis for B == 1 decode/prefill shapes) so neither core idles.
    # TODO(synk): if xprof shows exposed K/V DMA between kv steps, add
    # pipeline_mode=pl.Buffered(3) on the K/V BlockSpecs (budget the extra VMEM).
    return pl.pallas_call(
        kernel,
        out_shape=jax.ShapeDtypeStruct((B, Lq, E), q.dtype),
        grid=(B, Lq // tq, Lk // tk),
        in_specs=[
            pl.BlockSpec((1, tq, E), lambda b, qi, ki: (b, qi, 0)),
            pl.BlockSpec((1, tk, E), lambda b, qi, ki: (b, ki, 0)),
            pl.BlockSpec((1, tk, E), lambda b, qi, ki: (b, ki, 0)),
        ],
        out_specs=pl.BlockSpec((1, tq, E), lambda b, qi, ki: (b, qi, 0)),
        scratch_shapes=[
            pltpu.VMEM((num_heads, tq, D), jnp.bfloat16),    # q * scale (head-major)
            pltpu.VMEM((num_heads, tk, D), jnp.bfloat16),    # current K block
            pltpu.VMEM((num_heads, tk, D), jnp.bfloat16),    # current V block
            pltpu.VMEM((num_heads, tq, 128), jnp.float32),   # running max (lane-replicated)
            pltpu.VMEM((num_heads, tq, 128), jnp.float32),   # running sum (lane-replicated)
            pltpu.VMEM((num_heads, tq, D), jnp.float32),     # output accumulator
        ],
        compiler_params=pltpu.CompilerParams(
            dimension_semantics=("parallel", "parallel", "arbitrary"),
            vmem_limit_bytes=_vmem_limit(est),
        ),
    )(q, k, v)


# -----------------------------------------------------------------------------
# Module wrapper
# -----------------------------------------------------------------------------
def init_mha_params(key, embed_dim):
    """PyTorch nn.Linear default init: U(-1/sqrt(fan_in), 1/sqrt(fan_in))."""
    bound = 1.0 / (embed_dim ** 0.5)
    params = {}
    names = ["query", "key", "value", "fc_out"]
    keys = jax.random.split(key, 2 * len(names))
    for i, name in enumerate(names):
        # stored as (in, out) so kernels compute x @ W
        w = jax.random.uniform(keys[2 * i], (embed_dim, embed_dim),
                               jnp.float32, -bound, bound)
        b = jax.random.uniform(keys[2 * i + 1], (embed_dim,),
                               jnp.float32, -bound, bound)
        params[name] = (w, b)
    return params


def _project_group(params, x, names):
    """Apply several projections sharing the same input with ONE fused GEMM."""
    B, L, E = x.shape
    w = jnp.concatenate([params[n][0] for n in names], axis=1)   # (E, len*E)
    b = jnp.concatenate([params[n][1] for n in names])
    y = linear(x.reshape(B * L, E), w, b)                        # x read from HBM once
    if len(names) == 1:
        return [y.reshape(B, L, E)]
    return [p.reshape(B, L, E) for p in jnp.split(y, len(names), axis=1)]


def multi_head_attention(params, queries, keys, values, num_heads):
    """queries: (B, Lq, E), keys/values: (B, Lk, E) -> (B, Lq, E).
    Eval-mode forward: attention_dropout / proj_dropout are identity."""
    if queries is keys and keys is values:            # self-attention: fused QKV GEMM
        q, k, v = _project_group(params, queries, ["query", "key", "value"])
    elif keys is values:                              # cross-attention: fused KV GEMM
        (q,) = _project_group(params, queries, ["query"])
        k, v = _project_group(params, keys, ["key", "value"])
    else:
        (q,) = _project_group(params, queries, ["query"])
        (k,) = _project_group(params, keys, ["key"])
        (v,) = _project_group(params, values, ["value"])

    # Attention in lane-dense [B, L, E] layout; no HBM head transposes.
    out = flash_mha(q, k, v, num_heads)               # (B, Lq, E)

    (out,) = _project_group(params, out, ["fc_out"])
    return out


# -----------------------------------------------------------------------------
# Reference (pure JAX, f32) for verification
# -----------------------------------------------------------------------------
def mha_reference(params, queries, keys, values, num_heads):
    B, Lq, E = queries.shape
    Lk = keys.shape[1]
    D = E // num_heads

    def proj(x, name):
        w, b = params[name]
        return x @ w + b

    q = proj(queries, "query").reshape(B, Lq, num_heads, D).transpose(0, 2, 1, 3)
    k = proj(keys, "key").reshape(B, Lk, num_heads, D).transpose(0, 2, 1, 3)
    v = proj(values, "value").reshape(B, Lk, num_heads, D).transpose(0, 2, 1, 3)

    energy = jnp.einsum("bhqd,bhkd->bhqk", q, k) / (D ** 0.5)
    attn = jax.nn.softmax(energy, axis=-1)
    out = jnp.einsum("bhqk,bhkd->bhqd", attn, v)
    out = out.transpose(0, 2, 1, 3).reshape(B, Lq, E)
    return proj(out, "fc_out")


if __name__ == "__main__":
    batch, q_len, kv_len = 2, 8, 16
    embed_dim, num_heads = 32, 4

    root = jax.random.PRNGKey(0)
    k_params, k_q, k_k, k_v = jax.random.split(root, 4)

    params = init_mha_params(k_params, embed_dim)
    queries = jax.random.normal(k_q, (batch, q_len, embed_dim), jnp.float32)
    keys = jax.random.normal(k_k, (batch, kv_len, embed_dim), jnp.float32)
    values = jax.random.normal(k_v, (batch, kv_len, embed_dim), jnp.float32)

    # bf16 MXU operands with f32 accumulation -> compare at bf16-level tolerance.
    tol = dict(atol=5e-2, rtol=5e-2)

    # Cross-attention path (separate Q / K / V projections).
    out = jax.block_until_ready(
        multi_head_attention(params, queries, keys, values, num_heads))
    ref = mha_reference(params, queries, keys, values, num_heads)
    assert out.shape == (batch, q_len, embed_dim)
    assert jnp.allclose(out, ref, **tol), "cross-attention mismatch vs reference"

    # Self-attention path (exercises the fused QKV projection GEMM).
    out_sa = jax.block_until_ready(
        multi_head_attention(params, queries, queries, queries, num_heads))
    ref_sa = mha_reference(params, queries, queries, queries, num_heads)
    assert jnp.allclose(out_sa, ref_sa, **tol), "self-attention mismatch vs reference"

    print("KERNEL_OK")
</pallas_src>

<mosaic_0001>
module attributes {stable_mosaic.version = 11 : i64} {
  func.func @_linear_kernel(%arg0: i32, %arg1: i32, %arg2: i32, %arg3: memref<16x32xf32, #tpu.memory_space<vmem>>, %arg4: memref<32x32xbf16, #tpu.memory_space<vmem>>, %arg5: memref<1x32xf32, #tpu.memory_space<vmem>>, %arg6: memref<16x32xf32, #tpu.memory_space<vmem>>, %arg7: memref<16x32xf32, #tpu.memory_space<vmem>>) attributes {dimension_semantics = [#tpu.dimension_semantics<parallel>, #tpu.dimension_semantics<parallel>, #tpu.dimension_semantics<arbitrary>], iteration_bounds = array<i64: 1, 1, 1>, scalar_prefetch = 0 : i64, scratch_operands = 1 : i64, tpu.core_type = #tpu.core_type<tc>, window_params = [{transform_indices = @transform_0, window_bounds = array<i64: 16, 32>}, {transform_indices = @transform_1, window_bounds = array<i64: 32, 32>}, {transform_indices = @transform_2, window_bounds = array<i64: 1, 32>}, {transform_indices = @transform_3, window_bounds = array<i64: 16, 32>}]} {
    %c0_i32 = arith.constant 0 : i32
    %0 = arith.cmpi eq, %arg2, %c0_i32 : i32
    %1 = arith.extui %0 : i1 to i32
    %c0_i32_0 = arith.constant 0 : i32
    %2 = arith.cmpi ne, %1, %c0_i32_0 : i32
    scf.if %2 {
      %cst_10 = arith.constant 0.000000e+00 : f32
      %13 = vector.broadcast %cst_10 : f32 to vector<16x32xf32>
      %c0_11 = arith.constant 0 : index
      %c0_12 = arith.constant 0 : index
      %14 = vector.load %arg7[%c0_11, %c0_12] : memref<16x32xf32, #tpu.memory_space<vmem>>, vector<16x32xf32>
      tpu.vector_store %arg7[%c0_11, %c0_12], %13 {strides = array<i32>} : memref<16x32xf32, #tpu.memory_space<vmem>>, vector<16x32xf32>,
    } else {
    }
    %c0 = arith.constant 0 : index
    %c0_1 = arith.constant 0 : index
    %3 = vector.load %arg7[%c0, %c0_1] : memref<16x32xf32, #tpu.memory_space<vmem>>, vector<16x32xf32>
    %c0_2 = arith.constant 0 : index
    %c0_3 = arith.constant 0 : index
    %4 = vector.load %arg3[%c0_2, %c0_3] : memref<16x32xf32, #tpu.memory_space<vmem>>, vector<16x32xf32>
    %5 = arith.truncf %4 : vector<16x32xf32> to vector<16x32xbf16>
    %c0_4 = arith.constant 0 : index
    %c0_5 = arith.constant 0 : index
    %6 = vector.load %arg4[%c0_4, %c0_5] : memref<32x32xbf16, #tpu.memory_space<vmem>>, vector<32x32xbf16>
    %cst = arith.constant dense<0.000000e+00> : vector<16x32xf32>
    %7 = tpu.matmul %5, %6, %cst {dimension_numbers = #tpu.dot_dimension_numbers<[1], [0], [0], [1], [0, 0, 1, 1], [], []>} : vector<16x32xbf16>, vector<32x32xbf16>, vector<16x32xf32> -> vector<16x32xf32>
    %8 = arith.addf %3, %7 : vector<16x32xf32>
    %c0_6 = arith.constant 0 : index
    %c0_7 = arith.constant 0 : index
    %9 = vector.load %arg7[%c0_6, %c0_7] : memref<16x32xf32, #tpu.memory_space<vmem>>, vector<16x32xf32>
    tpu.vector_store %arg7[%c0_6, %c0_7], %8 {strides = array<i32>} : memref<16x32xf32, #tpu.memory_space<vmem>>, vector<16x32xf32>,
    %c0_i32_8 = arith.constant 0 : i32
    %10 = arith.cmpi eq, %arg2, %c0_i32_8 : i32
    %11 = arith.extui %10 : i1 to i32
    %c0_i32_9 = arith.constant 0 : i32
    %12 = arith.cmpi ne, %11, %c0_i32_9 : i32
    scf.if %12 {
      %c0_10 = arith.constant 0 : index
      %c0_11 = arith.constant 0 : index
      %13 = vector.load %arg7[%c0_10, %c0_11] : memref<16x32xf32, #tpu.memory_space<vmem>>, vector<16x32xf32>
      %c0_12 = arith.constant 0 : index
      %c0_13 = arith.constant 0 : index
      %14 = vector.load %arg5[%c0_12, %c0_13] : memref<1x32xf32, #tpu.memory_space<vmem>>, vector<1x32xf32>
      %15 = vector.broadcast %14 : vector<1x32xf32> to vector<16x32xf32>
      %16 = arith.addf %13, %15 : vector<16x32xf32>
      %c0_14 = arith.constant 0 : index
      %c0_15 = arith.constant 0 : index
      %17 = vector.load %arg6[%c0_14, %c0_15] : memref<16x32xf32, #tpu.memory_space<vmem>>, vector<16x32xf32>
      tpu.vector_store %arg6[%c0_14, %c0_15], %16 {strides = array<i32>} : memref<16x32xf32, #tpu.memory_space<vmem>>, vector<16x32xf32>,
    } else {
    }
    return
  }
  func.func @transform_0(%arg0: i32, %arg1: i32, %arg2: i32) -> (i32, i32) {
    %c0_i32 = arith.constant 0 : i32
    return %arg0, %arg2 : i32, i32
  }
  func.func @transform_1(%arg0: i32, %arg1: i32, %arg2: i32) -> (i32, i32) {
    %c0_i32 = arith.constant 0 : i32
    return %arg2, %arg1 : i32, i32
  }
  func.func @transform_2(%arg0: i32, %arg1: i32, %arg2: i32) -> (i32, i32) {
    %c0_i32 = arith.constant 0 : i32
    %c0_i32_0 = arith.constant 0 : i32
    return %c0_i32, %arg1 : i32, i32
  }
  func.func @transform_3(%arg0: i32, %arg1: i32, %arg2: i32) -> (i32, i32) {
    %c0_i32 = arith.constant 0 : i32
    return %arg0, %arg1 : i32, i32
  }
}

</mosaic_0001>

<bundles_post_ra>
// kernel: tpu_custom_call.1
= control target key start
LH: loop header
LB: loop body
LE: loop exit
PB: predicated region body
PF: predicated region fallthrough
CT: control target
= control target key end

     0   :  { %8 = vsyncpa [#allocation4], 0  ;;  %s282_s0 = inlined_call_operand.hbm [shape: f32[16,32], index: 0, kind: input, shape index: {}]   ;;  %s283_s1 = inlined_call_operand.hbm [shape: bf16[32,32], index: 1, kind: input, shape index: {}]   ;;  %s284_s2 = inlined_call_operand.vmem [shape: f32[1,32], index: 2, kind: input, shape index: {}]   ;;  %s285_s3 = inlined_call_operand.hbm [shape: f32[16,32], index: 3, kind: output, shape index: {}]  }
   0x1   :  { %9 = vsyncpa [#allocation7], 0 }
   0x2   :  { %10 = vsyncpa [#allocation5], 0  ;;  %s15_s14 = sshll.u32 %s282_s0, 4  ;;  %s229_s15 = smov [#allocation3]   ;;  %s16_s14 = int_to_ptr.hbm [resolvable:$true] %s15_s14 }
   0x3   :  { %s17_s16 = sshll.u32 %s229_s15, 4  ;;  %s28_s19 = sshll.u32 %s283_s1, 4  ;;  %s18_s16 = int_to_ptr.vmem [resolvable:$true] %s17_s16  ;;  %s29_s19 = int_to_ptr.hbm [resolvable:$true] %s28_s19 }
   0x4   :  { %s230_s20 = smov 128   ;;  %s231_s21 = smov 8  }
   0x5   :  { %23 = dma.hbm_to_vmem [thread:$0]  %s16_s14, 256, %s18_s16, [#allocation4], %s230_s20, %s230_s20, %s231_s21  }
   0x6   :  { %s232_s22 = smov [#allocation6]   ;;  %s233_s24 = smov 64  }
   0x7   :  { %s30_s23 = sshll.u32 %s232_s22, 4  ;;  %s234_s0 = smov 4   ;;  %s31_s23 = int_to_ptr.vmem [resolvable:$true] %s30_s23 }
   0x8   :  { %36 = dma.hbm_to_vmem [thread:$0]  %s29_s19, 256, %s31_s23, [#allocation7], %s233_s24, %s233_s24, %s234_s0  }
   0x9   :  { %223 = dma.done.wait [#allocation4], 256  }
   0xa   :  { %224 = vsyncadd [#allocation4], 4294967040 }
   0xb   :  { %225 = dma.done.wait [#allocation7], 256  }
   0xc   :  { %226 = vsyncadd [#allocation7], 4294967040  ;;  %vm52_vm0 = vcmask 261120   ;;  %v235_v0 = vmov 0.0   ;;  %v141_v1 = vld [vmem:[#allocation6 + $0x8] sm:$0xff]  ;;  %v140_v2 = vld [vmem:[#allocation6] sm:$0xff] }
   0xd   :  { %53 = vst.msk [vmem:[#allocation2] sm:$0xff] %vm52_vm0, %v235_v0  ;;  %86 = vmatpush.bf16.msra.mxu0 %v141_v1  ;;  %v57_v3 = vld [vmem:[#allocation3] sm:$0xff]  ;;  %v58_v4 = vld [vmem:[#allocation3 + $0x8] sm:$0xff]  ;;  %v150_v10 = vld [vmem:[%s284_s2] ss:$0 sm:$0xff]  ;;  %s236_s26 = smov [#allocation8]  }
   0xe   :  { %54 = vst.msk [vmem:[#allocation2 + $0x8] sm:$0xff] %vm52_vm0, %v235_v0  ;;  %v59_v5 = vpack.c.bf16 %v58_v4, %v57_v3  ;;  %s115_s27 = sshll.u32 %s236_s26, 4  ;;  %s117_s30 = sshll.u32 %s285_s3, 4  ;;  %s116_s27 = int_to_ptr.vmem [resolvable:$true] %s115_s27  ;;  %s118_s30 = int_to_ptr.hbm [resolvable:$true] %s117_s30 }
  0x11   :  { %87 = vmatpush.bf16.msra.mxu0 %v140_v2 }
  0x14   :  { %139 = vmatmul.msk.bf16.vlgmr.msra.gmra.mxu0 %vm52_vm0, %v59_v5  ;;  %v55_v6 = vld [vmem:[#allocation2] sm:$0xff] }
  0x15   :  { %v56_v9 = vld [vmem:[#allocation2 + $0x8] sm:$0xff] }
  0x91   :  { %v89_v7 = vpop.f32.mrf.mxu0 }
  0x92   :  { %v94_v8 = vadd.f32 %v89_v7, %v55_v6 }
  0x94   :  { %96 = vst.msk [vmem:[#allocation2] sm:$0xff] %vm52_vm0, %v94_v8 }
  0x99   :  { %v91_v11 = vpop.f32.mrf.mxu0 }
  0x9a   :  { %v95_v12 = vadd.f32 %v91_v11, %v56_v9 }
  0x9b   :  { %v101_v13 = vld [vmem:[#allocation2] sm:$0xff] }
  0x9c   :  { %97 = vst.msk [vmem:[#allocation2 + $0x8] sm:$0xff] %vm52_vm0, %v95_v12  ;;  %v107_v14 = vadd.f32 %v150_v10, %v101_v13 }
  0x9e   :  { %109 = vst.msk [vmem:[#allocation8] sm:$0xff] %vm52_vm0, %v107_v14 }
  0xa3   :  { %v102_v15 = vld [vmem:[#allocation2 + $0x8] sm:$0xff] }
  0xa4   :  { %v108_v16 = vadd.f32 %v150_v10, %v102_v15 }
  0xa6   :  { %110 = vst.msk [vmem:[#allocation8 + $0x8] sm:$0xff] %vm52_vm0, %v108_v16 }
  0xa7   :  { %123 = dma.vmem_to_hbm [thread:$0]  %s116_s27, 256, %s118_s30, [#allocation5], %s230_s20, %s230_s20, %s231_s21  }
  0xa8   :  { %227 = dma.done.wait [#allocation5], 256  }
  0xa9   :  { %228 = vsyncadd [#allocation5], 4294967040 }
  0xaa   :  { %128 = vsyncpa [#allocation4], 1 }
  0xab   :  { %129 = vsyncpa [#allocation7], 1 }
  0xac   :  { %130 = vsyncpa [#allocation5], 1 }

</bundles_post_ra>
